<compile_context>
chip_gen: v7x
topology: tpu7x:2x2x1
jax: 0.10.0
libtpu: 0.0.40
codegen_flags: <defaults>
</compile_context>

<pallas_src>
import functools

import jax
import jax.numpy as jnp
from jax import lax
from jax.experimental import pallas as pl
from jax.experimental.pallas import tpu as pltpu


def _round_up(x, m):
    return ((x + m - 1) // m) * m


def _conv_slab_kernel(x_hbm, w_ref, b_ref, o_ref, slab_ref, sem, kbuf_ref, *,
                      tap_offsets, tile_m, slab_len, cin_p, n_m_tiles):
    """One (image, cout-tile, m-tile) grid step.

    x_hbm    : (N, Cin_p, R)           bf16, HBM (memory_space=ANY, manual DMA)
    w_ref    : (tile_cout, K_total)    bf16, VMEM (K_total = KH*KW*Cin_p)
    b_ref    : (tile_cout, 1)          f32,  VMEM
    o_ref    : (1, tile_cout, tile_m)  output block (lane-dense: M on lanes)
    slab_ref : (2, Cin_p, slab_len)    bf16 VMEM double-buffered union slab
    sem      : DMA semaphores, shape (2,)
    kbuf_ref : (K_total, tile_m)       bf16 VMEM staged fused-K operand
    """
    b = pl.program_id(0)
    i = pl.program_id(2)
    slot = i % 2

    def start_slab(step, s):
        # Clamp so the (never-taken) prefetch issued at the last m-tile of a
        # sweep still describes an in-bounds source slice.
        step = jnp.minimum(step, n_m_tiles - 1)
        base = pl.multiple_of(step * tile_m, 128)
        pltpu.make_async_copy(
            x_hbm.at[b, :, pl.ds(base, slab_len)],
            slab_ref.at[s],
            sem.at[s],
        ).start()

    # First m-tile of this (image, cout-tile) sweep: nothing in flight yet.
    @pl.when(i == 0)
    def _():
        start_slab(i, slot)

    # Prefetch the NEXT m-tile's slab into the other slot; it overlaps with
    # the staging + matmul below.
    @pl.when(i + 1 < n_m_tiles)
    def _():
        start_slab(i + 1, 1 - slot)

    # Wait for the current slab (descriptor only used for shape/semaphore).
    pltpu.make_async_copy(
        x_hbm.at[b, :, pl.ds(0, slab_len)], slab_ref.at[slot], sem.at[slot]
    ).wait()

    # Stage the KH*KW shifted tap windows out of the slab into one
    # (KH*KW*Cin_p, tile_m) operand (pure in-VMEM vector copies).
    for t, off in enumerate(tap_offsets):
        kbuf_ref[pl.ds(t * cin_p, cin_p), :] = \
            slab_ref[slot, :, pl.ds(off, tile_m)]

    # Single MXU matmul with K = KH*KW*Cin_p, f32 accumulation, bias fused.
    acc = jnp.dot(w_ref[...], kbuf_ref[...], preferred_element_type=jnp.float32)
    o_ref[0] = (acc + b_ref[...]).astype(o_ref.dtype)


@functools.partial(jax.jit,
                   static_argnames=("stride", "padding", "tile_m", "tile_cout"))
def norm_conv2d(x, weight, bias, *, stride=1, padding=1, tile_m=1024,
                tile_cout=128):
    """NormConv2d forward with norm='none': y = Conv2d(x); norm = Identity."""
    if stride != 1:
        # TODO(synk): stride > 1 needs strided tap slicing (pl.ds(..., stride=s)).
        raise NotImplementedError("Pallas NormConv2d kernel supports stride=1")

    n, cin, h, w = x.shape
    cout, cin_w, kh, kw = weight.shape
    assert cin == cin_w

    hp, wp = h + 2 * padding, w + 2 * padding
    oh, ow = hp - kh + 1, wp - kw + 1

    # bf16 sublane packing: pad Cin to a multiple of 16.
    cin_p = _round_up(cin, 16)
    k_total = kh * kw * cin_p

    # Optional Cout tiling (keeps the f32 result block small for large Cout).
    tile_cout = max(8, (min(tile_cout, _round_up(cout, 8)) // 8) * 8)
    cout_p = _round_up(cout, tile_cout)
    n_cout_tiles = cout_p // tile_cout

    # M = flattened "output rows" per image (incl. junk ox >= OW columns),
    # sits on the 128-lane axis.  Clamp tile to the work actually present.
    m_valid = oh * wp
    tile_m = max(128, (tile_m // 128) * 128)
    tile_m = min(tile_m, _round_up(m_valid, 128))
    n_m_tiles = pl.cdiv(m_valid, tile_m)
    mp = n_m_tiles * tile_m

    # Union-slab window: tile_m output rows need taps reaching up to
    # (KH-1)*Wp + (KW-1) further along the flattened padded image.
    slab_len = _round_up(tile_m + (kh - 1) * wp + (kw - 1), 128)
    rp = (n_m_tiles - 1) * tile_m + slab_len         # last base + slab_len

    # ---- wrapper-side layout: cast to bf16 FIRST, one fused pad pass ----
    rows_needed = pl.cdiv(rp, wp)                    # >= Hp (since rp >= Hp*Wp)
    pad_bottom = rows_needed - h - padding
    xb = x.astype(jnp.bfloat16)
    xp = jnp.pad(xb, ((0, 0), (0, cin_p - cin),
                      (padding, pad_bottom), (padding, padding)))
    x_flat = xp.reshape(n, cin_p, rows_needed * wp)  # (N, Cin_p, R), R >= rp

    # w2[co, (ky*KW + kx)*Cin_p + ci] = weight[co, ci, ky, kx]
    w2 = jnp.pad(weight, ((0, cout_p - cout), (0, cin_p - cin),
                          (0, 0), (0, 0))).astype(jnp.bfloat16)
    w2 = w2.transpose(0, 2, 3, 1).reshape(cout_p, k_total)
    bias2 = jnp.pad(bias, (0, cout_p - cout)).reshape(cout_p, 1)
    bias2 = bias2.astype(jnp.float32)

    tap_offsets = tuple(ky * wp + kx for ky in range(kh) for kx in range(kw))

    kernel = functools.partial(
        _conv_slab_kernel, tap_offsets=tap_offsets, tile_m=tile_m,
        slab_len=slab_len, cin_p=cin_p, n_m_tiles=n_m_tiles)

    out_flat = pl.pallas_call(
        kernel,
        out_shape=jax.ShapeDtypeStruct((n, cout_p, mp), x.dtype),
        grid_spec=pltpu.PrefetchScalarGridSpec(
            num_scalar_prefetch=0,
            grid=(n, n_cout_tiles, n_m_tiles),
            in_specs=[
                pl.BlockSpec(memory_space=pl.ANY),                  # x in HBM
                # TODO(synk): pipeline_mode=pl.Buffered(1) would single-buffer
                # these constant-index blocks and save VMEM for large Cin/Cout.
                pl.BlockSpec((tile_cout, k_total), lambda b, j, i: (j, 0)),
                pl.BlockSpec((tile_cout, 1), lambda b, j, i: (j, 0)),
            ],
            out_specs=pl.BlockSpec((1, tile_cout, tile_m),
                                   lambda b, j, i: (b, j, i)),
            scratch_shapes=[
                pltpu.VMEM((2, cin_p, slab_len), jnp.bfloat16),     # union slab
                pltpu.SemaphoreType.DMA((2,)),
                pltpu.VMEM((k_total, tile_m), jnp.bfloat16),        # fused-K op
            ],
        ),
        compiler_params=pltpu.CompilerParams(
            # m axis is "arbitrary" so the manual slab prefetch chain is a
            # self-contained sweep per (image, cout-tile) even when the
            # parallel axes are split across TensorCores (v7x megacore).
            dimension_semantics=("parallel", "parallel", "arbitrary"),
            # 48 MiB leaves headroom on v7x (64 MiB/TC) and still allows much
            # larger tiles on v5e/v6e (128 MiB).
            vmem_limit_bytes=48 * 1024 * 1024,
        ),
    )(x_flat, w2, bias2)

    # (N, Cout_p, Mp) -> drop channel/tile padding, un-flatten, drop junk cols.
    y = out_flat[:, :cout, :m_valid].reshape(n, cout, oh, wp)[:, :, :, :ow]
    # norm_type == 'none' -> nn.Identity(); nothing more to do.
    return y


if __name__ == "__main__":
    key = jax.random.PRNGKey(0)
    k_x, k_w, k_b = jax.random.split(key, 3)

    N, Cin, H, W = 2, 4, 16, 16
    Cout, KH, KW = 8, 3, 3
    stride, padding = 1, 1

    x = jax.random.normal(k_x, (N, Cin, H, W), dtype=jnp.float32)
    # Deterministic, Conv2d-like init (uniform in +/- 1/sqrt(fan_in)).
    fan_in = Cin * KH * KW
    bound = 1.0 / (fan_in ** 0.5)
    weight = jax.random.uniform(k_w, (Cout, Cin, KH, KW), jnp.float32, -bound, bound)
    bias = jax.random.uniform(k_b, (Cout,), jnp.float32, -bound, bound)

    y = norm_conv2d(x, weight, bias, stride=stride, padding=padding)
    y = jax.block_until_ready(y)

    # Reference with the same math (bf16 operands, f32 accumulation).
    xb = x.astype(jnp.bfloat16).astype(jnp.float32)
    wb = weight.astype(jnp.bfloat16).astype(jnp.float32)
    y_ref = lax.conv_general_dilated(
        xb, wb, window_strides=(stride, stride),
        padding=((padding, padding), (padding, padding)),
        dimension_numbers=("NCHW", "OIHW", "NCHW"),
    ) + bias.reshape(1, Cout, 1, 1)

    assert y.shape == (N, Cout, H, W), y.shape
    max_err = float(jnp.max(jnp.abs(y - y_ref)))
    assert jnp.allclose(y, y_ref, atol=1e-3, rtol=1e-3), max_err
    print("KERNEL_OK")
</pallas_src>

<mosaic_0001>
module attributes {stable_mosaic.version = 11 : i64} {
  func.func @_conv_slab_kernel(%arg0: i32, %arg1: i32, %arg2: i32, %arg3: memref<2x16x522xbf16, #tpu.memory_space<any>>, %arg4: memref<8x144xbf16, #tpu.memory_space<vmem>>, %arg5: memref<8x1xf32, #tpu.memory_space<vmem>>, %arg6: memref<1x8x384xf32, #tpu.memory_space<vmem>>, %arg7: memref<2x16x512xbf16, #tpu.memory_space<vmem>>, %arg8: memref<2x!tpu.dma_semaphore, #tpu.memory_space<semaphore_mem>>, %arg9: memref<144x384xbf16, #tpu.memory_space<vmem>>) attributes {dimension_semantics = [#tpu.dimension_semantics<parallel>, #tpu.dimension_semantics<parallel>, #tpu.dimension_semantics<arbitrary>], iteration_bounds = array<i64: 2, 1, 1>, scalar_prefetch = 0 : i64, scratch_operands = 3 : i64, tpu.core_type = #tpu.core_type<tc>, window_params = [{}, {transform_indices = @transform_1, window_bounds = array<i64: 8, 144>}, {transform_indices = @transform_2, window_bounds = array<i64: 8, 1>}, {transform_indices = @transform_3, window_bounds = array<i64: 1, 8, 384>}]} {
    %c2_i32 = arith.constant 2 : i32
    %c0_i32 = arith.constant 0 : i32
    %0 = arith.cmpi eq, %c2_i32, %c0_i32 : i32
    %c1_i32 = arith.constant 1 : i32
    %1 = arith.select %0, %c1_i32, %c2_i32 : i32
    %2 = arith.remsi %arg2, %1 : i32
    %c0_i32_0 = arith.constant 0 : i32
    %3 = arith.cmpi ne, %2, %c0_i32_0 : i32
    %c0_i32_1 = arith.constant 0 : i32
    %4 = arith.cmpi slt, %2, %c0_i32_1 : i32
    %c0_i32_2 = arith.constant 0 : i32
    %5 = arith.cmpi slt, %1, %c0_i32_2 : i32
    %6 = arith.xori %4, %5 : i1
    %7 = arith.andi %6, %3 : i1
    %8 = arith.addi %2, %1 : i32
    %9 = arith.select %7, %8, %2 : i32
    %c0_i32_3 = arith.constant 0 : i32
    %10 = arith.cmpi eq, %arg2, %c0_i32_3 : i32
    %11 = arith.extui %10 : i1 to i32
    %c0_i32_4 = arith.constant 0 : i32
    %12 = arith.cmpi ne, %11, %c0_i32_4 : i32
    scf.if %12 {
      %c0_i32_40 = arith.constant 0 : i32
      %68 = arith.minsi %arg2, %c0_i32_40 : i32
      %c384_i32 = arith.constant 384 : i32
      %69 = arith.muli %68, %c384_i32 : i32
      %70 = tpu.assume_multiple %69, 128 : i32
      %c0_i32_41 = arith.constant 0 : i32
      %71 = tpu.memref_slice %arg3[%arg0, %c0_i32_41, %70] : memref<2x16x522xbf16, #tpu.memory_space<any>> -> memref<1x16x512xbf16, #tpu.memory_space<any>>
      %72 = tpu.memref_squeeze %71 : memref<1x16x512xbf16, #tpu.memory_space<any>> -> memref<16x512xbf16, #tpu.memory_space<any>>
      %c0_i32_42 = arith.constant 0 : i32
      %c0_i32_43 = arith.constant 0 : i32
      %73 = tpu.memref_slice %arg7[%9, %c0_i32_42, %c0_i32_43] : memref<2x16x512xbf16, #tpu.memory_space<vmem>> -> memref<1x16x512xbf16, #tpu.memory_space<vmem>>
      %74 = tpu.memref_squeeze %73 : memref<1x16x512xbf16, #tpu.memory_space<vmem>> -> memref<16x512xbf16, #tpu.memory_space<vmem>>
      %75 = tpu.memref_slice %arg8[%9] : memref<2x!tpu.dma_semaphore, #tpu.memory_space<semaphore_mem>> -> memref<1x!tpu.dma_semaphore, #tpu.memory_space<semaphore_mem>>
      %76 = tpu.memref_squeeze %75 : memref<1x!tpu.dma_semaphore, #tpu.memory_space<semaphore_mem>> -> memref<!tpu.dma_semaphore, #tpu.memory_space<semaphore_mem>>
      tpu.enqueue_dma source(%72 : memref<16x512xbf16, #tpu.memory_space<any>>) target(%74 : memref<16x512xbf16, #tpu.memory_space<vmem>>) target_semaphore(%76 : memref<!tpu.dma_semaphore, #tpu.memory_space<semaphore_mem>>)
    } else {
    }
    %c1_i32_5 = arith.constant 1 : i32
    %13 = arith.addi %arg2, %c1_i32_5 : i32
    %c1_i32_6 = arith.constant 1 : i32
    %14 = arith.cmpi slt, %13, %c1_i32_6 : i32
    %15 = arith.extui %14 : i1 to i32
    %c0_i32_7 = arith.constant 0 : i32
    %16 = arith.cmpi ne, %15, %c0_i32_7 : i32
    scf.if %16 {
      %c1_i32_40 = arith.constant 1 : i32
      %68 = arith.addi %arg2, %c1_i32_40 : i32
      %c1_i32_41 = arith.constant 1 : i32
      %69 = arith.subi %c1_i32_41, %9 : i32
      %c0_i32_42 = arith.constant 0 : i32
      %70 = arith.minsi %68, %c0_i32_42 : i32
      %c384_i32 = arith.constant 384 : i32
      %71 = arith.muli %70, %c384_i32 : i32
      %72 = tpu.assume_multiple %71, 128 : i32
      %c0_i32_43 = arith.constant 0 : i32
      %73 = tpu.memref_slice %arg3[%arg0, %c0_i32_43, %72] : memref<2x16x522xbf16, #tpu.memory_space<any>> -> memref<1x16x512xbf16, #tpu.memory_space<any>>
      %74 = tpu.memref_squeeze %73 : memref<1x16x512xbf16, #tpu.memory_space<any>> -> memref<16x512xbf16, #tpu.memory_space<any>>
      %c0_i32_44 = arith.constant 0 : i32
      %c0_i32_45 = arith.constant 0 : i32
      %75 = tpu.memref_slice %arg7[%69, %c0_i32_44, %c0_i32_45] : memref<2x16x512xbf16, #tpu.memory_space<vmem>> -> memref<1x16x512xbf16, #tpu.memory_space<vmem>>
      %76 = tpu.memref_squeeze %75 : memref<1x16x512xbf16, #tpu.memory_space<vmem>> -> memref<16x512xbf16, #tpu.memory_space<vmem>>
      %77 = tpu.memref_slice %arg8[%69] : memref<2x!tpu.dma_semaphore, #tpu.memory_space<semaphore_mem>> -> memref<1x!tpu.dma_semaphore, #tpu.memory_space<semaphore_mem>>
      %78 = tpu.memref_squeeze %77 : memref<1x!tpu.dma_semaphore, #tpu.memory_space<semaphore_mem>> -> memref<!tpu.dma_semaphore, #tpu.memory_space<semaphore_mem>>
      tpu.enqueue_dma source(%74 : memref<16x512xbf16, #tpu.memory_space<any>>) target(%76 : memref<16x512xbf16, #tpu.memory_space<vmem>>) target_semaphore(%78 : memref<!tpu.dma_semaphore, #tpu.memory_space<semaphore_mem>>)
    } else {
    }
    %c0_i32_8 = arith.constant 0 : i32
    %c0_i32_9 = arith.constant 0 : i32
    %17 = tpu.memref_slice %arg3[%arg0, %c0_i32_8, %c0_i32_9] : memref<2x16x522xbf16, #tpu.memory_space<any>> -> memref<1x16x512xbf16, #tpu.memory_space<any>>
    %18 = tpu.memref_squeeze %17 : memref<1x16x512xbf16, #tpu.memory_space<any>> -> memref<16x512xbf16, #tpu.memory_space<any>>
    %c0_i32_10 = arith.constant 0 : i32
    %c0_i32_11 = arith.constant 0 : i32
    %19 = tpu.memref_slice %arg7[%9, %c0_i32_10, %c0_i32_11] : memref<2x16x512xbf16, #tpu.memory_space<vmem>> -> memref<1x16x512xbf16, #tpu.memory_space<vmem>>
    %20 = tpu.memref_squeeze %19 : memref<1x16x512xbf16, #tpu.memory_space<vmem>> -> memref<16x512xbf16, #tpu.memory_space<vmem>>
    %21 = tpu.memref_slice %arg8[%9] : memref<2x!tpu.dma_semaphore, #tpu.memory_space<semaphore_mem>> -> memref<1x!tpu.dma_semaphore, #tpu.memory_space<semaphore_mem>>
    %22 = tpu.memref_squeeze %21 : memref<1x!tpu.dma_semaphore, #tpu.memory_space<semaphore_mem>> -> memref<!tpu.dma_semaphore, #tpu.memory_space<semaphore_mem>>
    tpu.wait_dma2 semaphore(%22 : memref<!tpu.dma_semaphore, #tpu.memory_space<semaphore_mem>>) src(%18 : memref<16x512xbf16, #tpu.memory_space<any>>) dst(%20 : memref<16x512xbf16, #tpu.memory_space<vmem>>)
    %23 = arith.index_cast %9 : i32 to index
    %c0 = arith.constant 0 : index
    %c0_12 = arith.constant 0 : index
    %24 = vector.load %arg7[%23, %c0, %c0_12] : memref<2x16x512xbf16, #tpu.memory_space<vmem>>, vector<1x16x384xbf16>
    %25 = vector.shape_cast %24 : vector<1x16x384xbf16> to vector<16x384xbf16>
    %c0_13 = arith.constant 0 : index
    %c0_14 = arith.constant 0 : index
    %26 = vector.load %arg9[%c0_13, %c0_14] : memref<144x384xbf16, #tpu.memory_space<vmem>>, vector<16x384xbf16>
    tpu.vector_store %arg9[%c0_13, %c0_14], %25 {strides = array<i32>} : memref<144x384xbf16, #tpu.memory_space<vmem>>, vector<16x384xbf16>,
    %27 = arith.index_cast %9 : i32 to index
    %c0_15 = arith.constant 0 : index
    %c1 = arith.constant 1 : index
    %28 = vector.load %arg7[%27, %c0_15, %c1] : memref<2x16x512xbf16, #tpu.memory_space<vmem>>, vector<1x16x384xbf16>
    %29 = vector.shape_cast %28 : vector<1x16x384xbf16> to vector<16x384xbf16>
    %c16 = arith.constant 16 : index
    %c0_16 = arith.constant 0 : index
    %30 = vector.load %arg9[%c16, %c0_16] : memref<144x384xbf16, #tpu.memory_space<vmem>>, vector<16x384xbf16>
    tpu.vector_store %arg9[%c16, %c0_16], %29 {strides = array<i32>} : memref<144x384xbf16, #tpu.memory_space<vmem>>, vector<16x384xbf16>,
    %31 = arith.index_cast %9 : i32 to index
    %c0_17 = arith.constant 0 : index
    %c2 = arith.constant 2 : index
    %32 = vector.load %arg7[%31, %c0_17, %c2] : memref<2x16x512xbf16, #tpu.memory_space<vmem>>, vector<1x16x384xbf16>
    %33 = vector.shape_cast %32 : vector<1x16x384xbf16> to vector<16x384xbf16>
    %c32 = arith.constant 32 : index
    %c0_18 = arith.constant 0 : index
    %34 = vector.load %arg9[%c32, %c0_18] : memref<144x384xbf16, #tpu.memory_space<vmem>>, vector<16x384xbf16>
    tpu.vector_store %arg9[%c32, %c0_18], %33 {strides = array<i32>} : memref<144x384xbf16, #tpu.memory_space<vmem>>, vector<16x384xbf16>,
    %35 = arith.index_cast %9 : i32 to index
    %c0_19 = arith.constant 0 : index
    %c18 = arith.constant 18 : index
    %36 = vector.load %arg7[%35, %c0_19, %c18] : memref<2x16x512xbf16, #tpu.memory_space<vmem>>, vector<1x16x384xbf16>
    %37 = vector.shape_cast %36 : vector<1x16x384xbf16> to vector<16x384xbf16>
    %c48 = arith.constant 48 : index
    %c0_20 = arith.constant 0 : index
    %38 = vector.load %arg9[%c48, %c0_20] : memref<144x384xbf16, #tpu.memory_space<vmem>>, vector<16x384xbf16>
    tpu.vector_store %arg9[%c48, %c0_20], %37 {strides = array<i32>} : memref<144x384xbf16, #tpu.memory_space<vmem>>, vector<16x384xbf16>,
    %39 = arith.index_cast %9 : i32 to index
    %c0_21 = arith.constant 0 : index
    %c19 = arith.constant 19 : index
    %40 = vector.load %arg7[%39, %c0_21, %c19] : memref<2x16x512xbf16, #tpu.memory_space<vmem>>, vector<1x16x384xbf16>
    %41 = vector.shape_cast %40 : vector<1x16x384xbf16> to vector<16x384xbf16>
    %c64 = arith.constant 64 : index
    %c0_22 = arith.constant 0 : index
    %42 = vector.load %arg9[%c64, %c0_22] : memref<144x384xbf16, #tpu.memory_space<vmem>>, vector<16x384xbf16>
    tpu.vector_store %arg9[%c64, %c0_22], %41 {strides = array<i32>} : memref<144x384xbf16, #tpu.memory_space<vmem>>, vector<16x384xbf16>,
    %43 = arith.index_cast %9 : i32 to index
    %c0_23 = arith.constant 0 : index
    %c20 = arith.constant 20 : index
    %44 = vector.load %arg7[%43, %c0_23, %c20] : memref<2x16x512xbf16, #tpu.memory_space<vmem>>, vector<1x16x384xbf16>
    %45 = vector.shape_cast %44 : vector<1x16x384xbf16> to vector<16x384xbf16>
    %c80 = arith.constant 80 : index
    %c0_24 = arith.constant 0 : index
    %46 = vector.load %arg9[%c80, %c0_24] : memref<144x384xbf16, #tpu.memory_space<vmem>>, vector<16x384xbf16>
    tpu.vector_store %arg9[%c80, %c0_24], %45 {strides = array<i32>} : memref<144x384xbf16, #tpu.memory_space<vmem>>, vector<16x384xbf16>,
    %47 = arith.index_cast %9 : i32 to index
    %c0_25 = arith.constant 0 : index
    %c36 = arith.constant 36 : index
    %48 = vector.load %arg7[%47, %c0_25, %c36] : memref<2x16x512xbf16, #tpu.memory_space<vmem>>, vector<1x16x384xbf16>
    %49 = vector.shape_cast %48 : vector<1x16x384xbf16> to vector<16x384xbf16>
    %c96 = arith.constant 96 : index
    %c0_26 = arith.constant 0 : index
    %50 = vector.load %arg9[%c96, %c0_26] : memref<144x384xbf16, #tpu.memory_space<vmem>>, vector<16x384xbf16>
    tpu.vector_store %arg9[%c96, %c0_26], %49 {strides = array<i32>} : memref<144x384xbf16, #tpu.memory_space<vmem>>, vector<16x384xbf16>,
    %51 = arith.index_cast %9 : i32 to index
    %c0_27 = arith.constant 0 : index
    %c37 = arith.constant 37 : index
    %52 = vector.load %arg7[%51, %c0_27, %c37] : memref<2x16x512xbf16, #tpu.memory_space<vmem>>, vector<1x16x384xbf16>
    %53 = vector.shape_cast %52 : vector<1x16x384xbf16> to vector<16x384xbf16>
    %c112 = arith.constant 112 : index
    %c0_28 = arith.constant 0 : index
    %54 = vector.load %arg9[%c112, %c0_28] : memref<144x384xbf16, #tpu.memory_space<vmem>>, vector<16x384xbf16>
    tpu.vector_store %arg9[%c112, %c0_28], %53 {strides = array<i32>} : memref<144x384xbf16, #tpu.memory_space<vmem>>, vector<16x384xbf16>,
    %55 = arith.index_cast %9 : i32 to index
    %c0_29 = arith.constant 0 : index
    %c38 = arith.constant 38 : index
    %56 = vector.load %arg7[%55, %c0_29, %c38] : memref<2x16x512xbf16, #tpu.memory_space<vmem>>, vector<1x16x384xbf16>
    %57 = vector.shape_cast %56 : vector<1x16x384xbf16> to vector<16x384xbf16>
    %c128 = arith.constant 128 : index
    %c0_30 = arith.constant 0 : index
    %58 = vector.load %arg9[%c128, %c0_30] : memref<144x384xbf16, #tpu.memory_space<vmem>>, vector<16x384xbf16>
    tpu.vector_store %arg9[%c128, %c0_30], %57 {strides = array<i32>} : memref<144x384xbf16, #tpu.memory_space<vmem>>, vector<16x384xbf16>,
    %c0_31 = arith.constant 0 : index
    %c0_32 = arith.constant 0 : index
    %59 = vector.load %arg4[%c0_31, %c0_32] : memref<8x144xbf16, #tpu.memory_space<vmem>>, vector<8x144xbf16>
    %c0_33 = arith.constant 0 : index
    %c0_34 = arith.constant 0 : index
    %60 = vector.load %arg9[%c0_33, %c0_34] : memref<144x384xbf16, #tpu.memory_space<vmem>>, vector<144x384xbf16>
    %cst = arith.constant dense<0.000000e+00> : vector<8x384xf32>
    %61 = tpu.matmul %59, %60, %cst {dimension_numbers = #tpu.dot_dimension_numbers<[1], [0], [0], [1], [0, 0, 1, 1], [], []>} : vector<8x144xbf16>, vector<144x384xbf16>, vector<8x384xf32> -> vector<8x384xf32>
    %c0_35 = arith.constant 0 : index
    %c0_36 = arith.constant 0 : index
    %62 = vector.load %arg5[%c0_35, %c0_36] : memref<8x1xf32, #tpu.memory_space<vmem>>, vector<8x1xf32>
    %63 = vector.broadcast %62 : vector<8x1xf32> to vector<8x384xf32>
    %64 = arith.addf %61, %63 : vector<8x384xf32>
    %c0_37 = arith.constant 0 : index
    %c0_38 = arith.constant 0 : index
    %c0_39 = arith.constant 0 : index
    %65 = vector.load %arg6[%c0_37, %c0_38, %c0_39] : memref<1x8x384xf32, #tpu.memory_space<vmem>>, vector<1x8x384xf32>
    %66 = vector.shape_cast %65 : vector<1x8x384xf32> to vector<8x384xf32>
    %67 = vector.shape_cast %64 : vector<8x384xf32> to vector<1x8x384xf32>
    tpu.vector_store %arg6[%c0_37, %c0_38, %c0_39], %67 {strides = array<i32>} : memref<1x8x384xf32, #tpu.memory_space<vmem>>, vector<1x8x384xf32>,
    return
  }
  func.func @transform_1(%arg0: i32, %arg1: i32, %arg2: i32) -> (i32, i32) {
    %c0_i32 = arith.constant 0 : i32
    %c0_i32_0 = arith.constant 0 : i32
    return %arg1, %c0_i32 : i32, i32
  }
  func.func @transform_2(%arg0: i32, %arg1: i32, %arg2: i32) -> (i32, i32) {
    %c0_i32 = arith.constant 0 : i32
    %c0_i32_0 = arith.constant 0 : i32
    return %arg1, %c0_i32 : i32, i32
  }
  func.func @transform_3(%arg0: i32, %arg1: i32, %arg2: i32) -> (i32, i32, i32) {
    %c0_i32 = arith.constant 0 : i32
    return %arg0, %arg1, %arg2 : i32, i32, i32
  }
}

</mosaic_0001>

<bundles_post_ra>
// kernel: norm_conv2d.1
= control target key start
LH: loop header
LB: loop body
LE: loop exit
PB: predicated region body
PF: predicated region fallthrough
CT: control target
= control target key end

     0   :  { %s1064_s12 = smov 0   ;;  %s1066_s13 = smov 0   ;;  %s1124_s0 = inlined_call_operand.vmem [shape: bf16[2,16,522], index: 0, kind: input, shape index: {}]   ;;  %s1125_s1 = inlined_call_operand.vmem [shape: bf16[8,144], index: 1, kind: input, shape index: {}]   ;;  %s1126_s2 = inlined_call_operand.vmem [shape: f32[8,1], index: 2, kind: input, shape index: {}]   ;;  %s1127_s3 = inlined_call_operand.vmem [shape: f32[2,8,384], index: 3, kind: output, shape index: {}]  }
   0x1   :  { %s1068_s14 = smov 0  }
   0x2 LB: > { %s32_s15 = sadd.s32 1, %s1029_s13  ;;  %p942_p0 = scmp.ge.s32.totalorder %s1033_s14, 1  ;;  %s1033_s14 = sphi %s1068_s14, %s13_s14   ;;  %s1029_s13 = sphi %s1066_s13, %s1129_s13   ;;  %s1025_s12 = sphi %s1064_s12, %s1128_s12  }
   0x3   : > { %p34_p1 = scmp.ge.s32.totalorder %s32_s15, 2  ;;  %p145_p2 = scmp.lt.s32.totalorder %s1033_s14, 3 }
   0x5   : > { %s1131_s15 = smov (%p34_p1, %s32_s15), 0  ;;  %p146_p3 = pnand %p942_p0, %p145_p2 }
   0x6   : > { %p189_p4 = scmp.lt.s32.totalorder (!%p146_p3), %s1025_s12, 1  ;;  %s970_s16 = smul.u32 (!%p146_p3), 40, %s1025_s12 }
   0x7   : > { %149 = sbr.rel (%p146_p3) target bundleno = 417 (0x1a1), region = 28 }
   0x8   : > { %s227_s19 = scalar_lea.vmem (!%p146_p3), %s1124_s0, %s970_s16 }
   0x9   : > { %v249_v0 = vld [vmem:[%s227_s19] sm:$0xf] (!%p146_p3)  ;;  %v251_v1 = vld [vmem:[%s227_s19 + $0x14] sm:$0xf] (!%p146_p3)  ;;  %v253_v2 = vld [vmem:[%s227_s19 + $0x4] sm:$0xf] (!%p146_p3) }
   0xa   : > { %250 = vst [vmem:[#allocation2] sm:$0xf] (!%p146_p3), %v249_v0  ;;  %252 = vst [vmem:[#allocation2 + $0x4] sm:$0xf] (!%p146_p3), %v251_v1  ;;  %v255_v3 = vld [vmem:[%s227_s19 + $0x18] sm:$0xf] (!%p146_p3) }
   0xb   : > { %v257_v4 = vld [vmem:[%s227_s19 + $0x8] sm:$0xf] (!%p146_p3)  ;;  %254 = vst [vmem:[#allocation2 + $0x8] sm:$0xf] (!%p146_p3), %v253_v2  ;;  %256 = vst [vmem:[#allocation2 + $0xc] sm:$0xf] (!%p146_p3), %v255_v3 }
   0xc   : > { %258 = vst [vmem:[#allocation2 + $0x10] sm:$0xf] (!%p146_p3), %v257_v4  ;;  %v259_v5 = vld [vmem:[%s227_s19 + $0x1c] sm:$0xf] (!%p146_p3)  ;;  %v261_v6 = vld [vmem:[%s227_s19 + $0xc] sm:$0xf] (!%p146_p3) }
   0xd   : > { %v263_v7 = vld [vmem:[%s227_s19 + $0x20] sm:$0xf] (!%p146_p3)  ;;  %260 = vst [vmem:[#allocation2 + $0x14] sm:$0xf] (!%p146_p3), %v259_v5  ;;  %262 = vst [vmem:[#allocation2 + $0x18] sm:$0xf] (!%p146_p3), %v261_v6 }
   0xe   : > { %s1133_s12 = smov (!%p189_p4, %s1025_s12), 1  ;;  %264 = vst [vmem:[#allocation2 + $0x1c] sm:$0xf] %v263_v7 }
   0xf   : > { %s972_s20 = smul.u32 24, %s1133_s12 }
  0x11   : > { %s1088_s23 = scalar_lea.vmem %s1127_s3, %s972_s20 }
  0x12   : > { %311 = vsyncadd [#allocation3], 512 }
  0x13   : > { %1021 = dma.done.wait [#allocation3], 512 }
  0x14   : > { %1022 = vsyncadd [#allocation3], 4294966784  ;;  %v1035_v8 = vmov 0   ;;  %v426_v9 = vld [vmem:[#allocation2 + $0x8] sm:$0xff]  ;;  %v425_v10 = vld [vmem:[#allocation2] sm:$0xff]  ;;  %s1036_s24 = smov 127  }
  0x15   : > { %718 = vmatprep.subr.bf16.mxu1 %v1035_v8  ;;  %1006 = vset.pattern.permute.xlu0 %v1035_v8  ;;  %v427_v11 = vld [vmem:[#allocation2 + $0x10] sm:$0xff]  ;;  %v428_v12 = vld [vmem:[#allocation2 + $0x18] sm:$0xff]  ;;  %s1037_s25 = smov 126   ;;  %s1038_s26 = smov 110   ;;  %v1096_v13 = vld [vmem:[%s1125_s1] sm:$0xff]  ;;  %vm673_vm0 = vcmask 130048  }
  0x16   : > { %435 = vrot.lane.b32.xlu0 %v426_v9, %s1036_s24  ;;  %433 = vrot.lane.b32.xlu1 %v425_v10, %s1036_s24  ;;  %s1039_s27 = smov 109   ;;  %s1040_s28 = smov 108   ;;  %v963_v14 = vcombine.high %v1096_v13, %v1096_v13  ;;  %v661_v15 = vld [vmem:[%s1126_s2] sm:$0xff]  ;;  %vm441_vm1 = vcmask 1039360   ;;  %vm467_vm2 = vcmask 1031168   ;;  %vm493_vm3 = vcmask 900096  }
  0x17   : > { %677 = vmatprep.subr.bf16.mxu0 %v426_v9  ;;  %719 = vmatpush1.bf16.msra.mxu1 %v427_v11  ;;  %s1041_s29 = smov 92   ;;  %s1042_s5 = smov 91   ;;  %vm519_vm4 = vcmask 891904   ;;  %vm545_vm5 = vcmask 883712   ;;  %vm571_vm6 = vcmask 752640   ;;  %vm597_vm7 = vcmask 744448  }
  0x18   : > { %678 = vmatpush1.bf16.msra.mxu0 %v425_v10  ;;  %720 = vmatprep.subr.bf16.mxu1 %v1035_v8  ;;  %s1043_s6 = smov 90   ;;  %vm623_vm8 = vcmask 736256  }
  0x19   : > { %964 = vmatprep.mubr.msk.bf16.mxu0 %vm673_vm0, %v963_v14  ;;  %965 = vmatprep.mubr.msk.bf16.mxu1 %vm673_vm0, %v963_v14 }
  0x1a   : > { %437 = vrot.lane.b32.xlu0 %v427_v11, %s1036_s24  ;;  %439 = vrot.lane.b32.xlu1 %v428_v12, %s1036_s24 }
  0x1e   : > { %461 = vrot.lane.b32.xlu0 %v426_v9, %s1037_s25  ;;  %463 = vrot.lane.b32.xlu1 %v427_v11, %s1037_s25 }
  0x22   : > { %459 = vrot.lane.b32.xlu0 %v425_v10, %s1037_s25  ;;  %465 = vrot.lane.b32.xlu1 %v428_v12, %s1037_s25 }
  0x26   : > { %487 = vrot.lane.b32.xlu0 %v426_v9, %s1038_s26  ;;  %489 = vrot.lane.b32.xlu1 %v427_v11, %s1038_s26 }
  0x2a   : > { %485 = vrot.lane.b32.xlu0 %v425_v10, %s1038_s26  ;;  %491 = vrot.lane.b32.xlu1 %v428_v12, %s1038_s26 }
  0x2e   : > { %513 = vrot.lane.b32.xlu0 %v426_v9, %s1039_s27  ;;  %515 = vrot.lane.b32.xlu1 %v427_v11, %s1039_s27 }
  0x32   : > { %511 = vrot.lane.b32.xlu0 %v425_v10, %s1039_s27  ;;  %517 = vrot.lane.b32.xlu1 %v428_v12, %s1039_s27 }
  0x36   : > { %539 = vrot.lane.b32.xlu0 %v426_v9, %s1040_s28  ;;  %541 = vrot.lane.b32.xlu1 %v427_v11, %s1040_s28 }
  0x3a   : > { %537 = vrot.lane.b32.xlu0 %v425_v10, %s1040_s28  ;;  %543 = vrot.lane.b32.xlu1 %v428_v12, %s1040_s28 }
  0x3e   : > { %565 = vrot.lane.b32.xlu0 %v426_v9, %s1041_s29  ;;  %567 = vrot.lane.b32.xlu1 %v427_v11, %s1041_s29 }
  0x42   : > { %563 = vrot.lane.b32.xlu0 %v425_v10, %s1041_s29  ;;  %569 = vrot.lane.b32.xlu1 %v428_v12, %s1041_s29 }
  0x46   : > { %591 = vrot.lane.b32.xlu0 %v426_v9, %s1042_s5  ;;  %593 = vrot.lane.b32.xlu1 %v427_v11, %s1042_s5 }
  0x4a   : > { %589 = vrot.lane.b32.xlu0 %v425_v10, %s1042_s5  ;;  %595 = vrot.lane.b32.xlu1 %v428_v12, %s1042_s5 }
  0x4e   : > { %617 = vrot.lane.b32.xlu0 %v426_v9, %s1043_s6  ;;  %619 = vrot.lane.b32.xlu1 %v427_v11, %s1043_s6  ;;  %v962_v9 = vcombine.low %v1096_v13, %v1096_v13 }
  0x52   : > { %615 = vrot.lane.b32.xlu0 %v425_v10, %s1043_s6  ;;  %621 = vrot.lane.b32.xlu1 %v428_v12, %s1043_s6 }
  0x56   : > { %664 = vperm.xlu0 %1006, %v661_v15  }
  0x88   : > { %v436_v16 = vpop.permute.xlu0 %435  ;;  %v434_v17 = vpop.permute.xlu1 %433 }
  0x89   : > { %v442_v22 = vsel %vm441_vm1, %v434_v17, %v436_v16 }
  0x8c   : > { %v438_v18 = vpop.permute.xlu0 %437  ;;  %v440_v19 = vpop.permute.xlu1 %439 }
  0x8d   : > { %v443_v20 = vsel %vm441_vm1, %v436_v16, %v438_v18  ;;  %v444_v21 = vsel %vm441_vm1, %v438_v18, %v440_v19 }
  0x8e   : > { %679 = vmatprep.subr.bf16.mxu0 %v443_v20  ;;  %721 = vmatpush1.bf16.msra.mxu1 %v444_v21 }
  0x8f   : > { %680 = vmatpush1.bf16.msra.mxu0 %v442_v22  ;;  %722 = vmatprep.subr.bf16.mxu1 %v1035_v8 }
  0x90   : > { %v462_v23 = vpop.permute.xlu0 %461  ;;  %v464_v24 = vpop.permute.xlu1 %463 }
  0x91   : > { %v469_v25 = vsel %vm467_vm2, %v462_v23, %v464_v24 }
  0x92   : > { %681 = vmatprep.subr.bf16.mxu0 %v469_v25 }
  0x94   : > { %v460_v26 = vpop.permute.xlu0 %459  ;;  %v466_v27 = vpop.permute.xlu1 %465 }
  0x95   : > { %v468_v28 = vsel %vm467_vm2, %v460_v26, %v462_v23  ;;  %v470_v29 = vsel %vm467_vm2, %v464_v24, %v466_v27 }
  0x96   : > { %682 = vmatpush1.bf16.msra.mxu0 %v468_v28  ;;  %723 = vmatpush1.bf16.msra.mxu1 %v470_v29 }
  0x97   : > { %724 = vmatprep.subr.bf16.mxu1 %v1035_v8 }
  0x98   : > { %v488_v30 = vpop.permute.xlu0 %487  ;;  %v490_v31 = vpop.permute.xlu1 %489 }
  0x99   : > { %v495_v32 = vsel %vm493_vm3, %v488_v30, %v490_v31 }
  0x9a   : > { %683 = vmatprep.subr.bf16.mxu0 %v495_v32 }
  0x9c   : > { %v486_v33 = vpop.permute.xlu0 %485  ;;  %v492_v34 = vpop.permute.xlu1 %491 }
  0x9d   : > { %v494_v35 = vsel %vm493_vm3, %v486_v33, %v488_v30  ;;  %v496_v36 = vsel %vm493_vm3, %v490_v31, %v492_v34 }
  0x9e   : > { %684 = vmatpush1.bf16.msra.mxu0 %v494_v35  ;;  %725 = vmatpush1.bf16.msra.mxu1 %v496_v36 }
  0x9f   : > { %726 = vmatprep.subr.bf16.mxu1 %v1035_v8 }
  0xa0   : > { %v514_v37 = vpop.permute.xlu0 %513  ;;  %v516_v38 = vpop.permute.xlu1 %515 }
  0xa1   : > { %v521_v39 = vsel %vm519_vm4, %v514_v37, %v516_v38 }
  0xa2   : > { %685 = vmatprep.subr.bf16.mxu0 %v521_v39 }
  0xa4   : > { %v512_v40 = vpop.permute.xlu0 %511  ;;  %v518_v41 = vpop.permute.xlu1 %517 }
  0xa5   : > { %v520_v42 = vsel %vm519_vm4, %v512_v40, %v514_v37  ;;  %v522_v43 = vsel %vm519_vm4, %v516_v38, %v518_v41 }
  0xa6   : > { %686 = vmatpush1.bf16.msra.mxu0 %v520_v42  ;;  %727 = vmatpush1.bf16.msra.mxu1 %v522_v43 }
  0xa7   : > { %728 = vmatprep.subr.bf16.mxu1 %v1035_v8 }
  0xa8   : > { %v540_v44 = vpop.permute.xlu0 %539  ;;  %v542_v45 = vpop.permute.xlu1 %541 }
  0xa9   : > { %v547_v46 = vsel %vm545_vm5, %v540_v44, %v542_v45 }
  0xaa   : > { %687 = vmatprep.subr.bf16.mxu0 %v547_v46 }
  0xac   : > { %v538_v47 = vpop.permute.xlu0 %537  ;;  %v544_v48 = vpop.permute.xlu1 %543 }
  0xad   : > { %v546_v49 = vsel %vm545_vm5, %v538_v47, %v540_v44  ;;  %v548_v50 = vsel %vm545_vm5, %v542_v45, %v544_v48 }
  0xae   : > { %688 = vmatpush1.bf16.msra.mxu0 %v546_v49  ;;  %729 = vmatpush1.bf16.msra.mxu1 %v548_v50 }
  0xaf   : > { %730 = vmatprep.subr.bf16.mxu1 %v1035_v8 }
  0xb0   : > { %v566_v51 = vpop.permute.xlu0 %565  ;;  %v568_v52 = vpop.permute.xlu1 %567 }
  0xb1   : > { %v573_v53 = vsel %vm571_vm6, %v566_v51, %v568_v52 }
  0xb2   : > { %689 = vmatprep.subr.bf16.mxu0 %v573_v53 }
  0xb4   : > { %v564_v54 = vpop.permute.xlu0 %563  ;;  %v570_v55 = vpop.permute.xlu1 %569 }
  0xb5   : > { %v572_v56 = vsel %vm571_vm6, %v564_v54, %v566_v51  ;;  %v574_v57 = vsel %vm571_vm6, %v568_v52, %v570_v55 }
  0xb6   : > { %690 = vmatpush1.bf16.msra.mxu0 %v572_v56  ;;  %731 = vmatpush1.bf16.msra.mxu1 %v574_v57 }
  0xb7   : > { %732 = vmatprep.subr.bf16.mxu1 %v1035_v8 }
  0xb8   : > { %v592_v58 = vpop.permute.xlu0 %591  ;;  %v594_v59 = vpop.permute.xlu1 %593 }
  0xb9   : > { %v599_v60 = vsel %vm597_vm7, %v592_v58, %v594_v59 }
  0xba   : > { %691 = vmatprep.subr.bf16.mxu0 %v599_v60 }
  0xbc   : > { %v590_v61 = vpop.permute.xlu0 %589  ;;  %v596_v62 = vpop.permute.xlu1 %595 }
  0xbd   : > { %v598_v63 = vsel %vm597_vm7, %v590_v61, %v592_v58  ;;  %v600_v0 = vsel %vm597_vm7, %v594_v59, %v596_v62 }
  0xbe   : > { %692 = vmatpush1.bf16.msra.mxu0 %v598_v63  ;;  %733 = vmatpush1.bf16.msra.mxu1 %v600_v0 }
  0xbf   : > { %734 = vmatprep.subr.bf16.mxu1 %v1035_v8 }
  0xc0   : > { %v618_v1 = vpop.permute.xlu0 %617  ;;  %v620_v2 = vpop.permute.xlu1 %619 }
  0xc1   : > { %v625_v3 = vsel %vm623_vm8, %v618_v1, %v620_v2 }
  0xc2   : > { %693 = vmatprep.subr.bf16.mxu0 %v625_v3 }
  0xc4   : > { %v616_v4 = vpop.permute.xlu0 %615  ;;  %v622_v5 = vpop.permute.xlu1 %621 }
  0xc5   : > { %v624_v6 = vsel %vm623_vm8, %v616_v4, %v618_v1  ;;  %v626_v7 = vsel %vm623_vm8, %v620_v2, %v622_v5 }
  0xc6   : > { %694 = vmatpush1.bf16.msra.mxu0 %v624_v6  ;;  %735 = vmatpush1.bf16.msra.mxu1 %v626_v7 }
  0xc9   : > { %710 = vmatmul.mubr.bf16.vlgmr.msra.gmra.mrb[0].mxu0 %v962_v9  ;;  %751 = vmatmul.mubr.bf16.vlgmr.msra.gmra.mrb[0].mxu1 %v962_v9 }
  0xd5   : > { %v665_v10 = vpop.permute.xlu0 %664 }
 0x19c   : > { %v711_v8 = vpop.f32.mrb[0].mxu0  ;;  %v752_v11 = vpop.f32.mrb[0].mxu1 }
 0x19d   : > { %v712_v12 = vadd.f32 %v711_v8, %v665_v10  ;;  %v753_v14 = vadd.f32 %v752_v11, %v665_v10  ;;  %v713_v15 = vpop.f32.mrb[1].mxu0  ;;  %v754_v16 = vpop.f32.mrb[1].mxu1 }
 0x19e   : > { %v714_v17 = vadd.f32 %v713_v15, %v665_v10  ;;  %v715_v18 = vpop.f32.mrb[2].mxu0  ;;  %v755_v19 = vpop.f32.mrb[2].mxu1 }
 0x19f   : > { %758 = vst [vmem:[%s1088_s23] sm:$0xff] %v712_v12  ;;  %760 = vst [vmem:[%s1088_s23 + $0x10] sm:$0xff] %v753_v14  ;;  %v716_v20 = vpop.f32.mrb[3].mxu0  ;;  %v756_v13 = vpop.f32.mrb[3].mxu1 }
 0x1a0   : > { %759 = vst [vmem:[%s1088_s23 + $0x8] sm:$0xff] %v714_v17 }
 0x1a1 PF: > { %s13_s14 = sadd.s32 1, %s1033_s14   ;;  %s1128_s12 = smov %s1029_s13 }
 0x1a2   : > { %p10_p5 = scmp.ge.s32.totalorder %s13_s14, 4   ;;  %s1129_s13 = smov %s1131_s15 }
 0x1a4   :  { %12 = sbr.rel (!%p10_p5) target bundleno = 2 (0x2), region = 180 }
 0x1ab   :  { %799 = vsyncmov [#allocation3] }
 0x1ae   :  { %s800_s9 = vpop.sfrf %799 }
 0x1af   :  { %p968_p6 = scmp.ne.s32.totalorder %s800_s9, 0 }
 0x1b1   :  { %804 = shalt.err (%p968_p6)  }
 0x1b2   :  { %806 = vsyncmov [#allocation3 + $0x1] }
 0x1b5   :  { %s807_s10 = vpop.sfrf %806 }
 0x1b6   :  { %p969_p7 = scmp.ne.s32.totalorder %s807_s10, 0 }
 0x1b8   :  { %811 = shalt.err (%p969_p7)  }

</bundles_post_ra>
